<compile_context>
chip_gen: v7x
topology: tpu7x:2x2x1
jax: 0.10.0
libtpu: 0.0.40
codegen_flags: <defaults>
</compile_context>

<pallas_src>
import functools

import jax
import jax.numpy as jnp
from jax.experimental import pallas as pl
from jax.experimental.pallas import tpu as pltpu

LANE = 128      # lane width (last dim)
SUBLANE = 8     # f32 sublane


def _round_up(x, m):
    return ((x + m - 1) // m) * m


def full_model_kernel(x_ref, w1_ref, b1_ref, w2_ref, b2_ref, c_ref, y_ref):
    """Fused concept-bottleneck forward for one batch tile.

    x_ref  : [TM, Dp]   bf16  flattened-image tile
    w1_ref : [Dp, NCp]  bf16  x_to_c weight, [in, out], lane-padded  (VMEM-resident)
    b1_ref : [1, NCp]   f32
    w2_ref : [NCp, NYp] bf16  c_to_y weight, [in, out], lane-padded  (VMEM-resident)
    b2_ref : [1, NYp]   f32
    c_ref  : [TM, NCp]  concept output tile
    y_ref  : [TM, NYp]  label output tile
    """
    # x_to_c_model: Linear(D -> n_concepts); bf16 MXU feed, f32 accumulation.
    logits_c = jnp.dot(x_ref[...], w1_ref[...], preferred_element_type=jnp.float32)
    logits_c = logits_c + b1_ref[...]               # broadcast (1, NCp), f32 VPU
    c = jax.nn.sigmoid(logits_c)                    # f32 (EUP)
    c_ref[...] = c.astype(c_ref.dtype)

    # c_to_y_model: Linear(n_concepts -> n_labels).  Padded concept lanes hold sigmoid(0)=0.5
    # but the corresponding w2 rows are zero, so they contribute nothing.
    logits_y = jnp.dot(c.astype(w2_ref.dtype), w2_ref[...],
                       preferred_element_type=jnp.float32)
    logits_y = logits_y + b2_ref[...]
    y_ref[...] = jax.nn.sigmoid(logits_y).astype(y_ref.dtype)


def prepare_params(w1, b1, w2, b2, *, compute_dtype=jnp.bfloat16):
    """One-time parameter prep: [out,in] -> [in,out], pad to 128 lanes, cast weights to bf16.

    Call once and reuse (do NOT call per forward): this replaces the per-call HBM transpose.
    Returns (w1_t, b1_p, w2_t, b2_p) plus the original dims needed to slice the outputs.
    """
    n_c, d = w1.shape
    n_y, n_c2 = w2.shape
    assert n_c2 == n_c
    dp = _round_up(d, LANE)
    ncp = _round_up(n_c, LANE)
    nyp = _round_up(n_y, LANE)

    w1_t = jnp.zeros((dp, ncp), compute_dtype).at[:d, :n_c].set(
        jnp.asarray(w1, compute_dtype).T)
    w2_t = jnp.zeros((ncp, nyp), compute_dtype).at[:n_c, :n_y].set(
        jnp.asarray(w2, compute_dtype).T)
    b1_p = jnp.zeros((1, ncp), jnp.float32).at[:, :n_c].set(
        jnp.asarray(b1, jnp.float32).reshape(1, n_c))
    b2_p = jnp.zeros((1, nyp), jnp.float32).at[:, :n_y].set(
        jnp.asarray(b2, jnp.float32).reshape(1, n_y))
    return w1_t, b1_p, w2_t, b2_p, d, n_c, n_y


def _pick_batch_tile(B, dp, ncp, nyp, out_isize):
    """Largest batch tile (multiple of 8, <=512) whose double-buffered tiles fit ~24 MiB."""
    budget = 24 << 20
    tm = 512
    while tm > SUBLANE:
        tile_bytes = 2 * (tm * dp * 2 + tm * (ncp + nyp) * out_isize)
        if tile_bytes <= budget:
            break
        tm //= 2
    tm = max(tm, SUBLANE)
    if B < tm:
        tm = _round_up(max(B, 1), SUBLANE)
    return tm


@functools.partial(jax.jit, static_argnames=("d", "n_c", "n_y"))
def full_model_forward(x, w1_t, b1_p, w2_t, b2_p, *, d, n_c, n_y):
    """Hot path: x is [B, C, H, W]; params are the prepared/padded arrays."""
    out_dtype = x.dtype
    B = x.shape[0]
    dp, ncp = w1_t.shape
    nyp = w2_t.shape[1]
    out_isize = jnp.dtype(out_dtype).itemsize

    # Flatten NCHW -> [B, D] (row-major, same as torch .view(B, -1)), cast to bf16,
    # zero-pad feature dim to Dp and batch to a multiple of the batch tile.
    x_flat = x.reshape(B, -1).astype(jnp.bfloat16)

    tm = _pick_batch_tile(B, dp, ncp, nyp, out_isize)     # batch tile, multiple of 8
    b_pad = _round_up(B, tm)
    x_p = jnp.pad(x_flat, ((0, b_pad - B), (0, dp - d)))

    # VMEM budget: double-buffered x tile + outputs, resident weights/biases, + margin.
    vmem_limit = (2 * (tm * dp * 2 + tm * (ncp + nyp) * out_isize)
                  + dp * ncp * 2 + ncp * nyp * 2 + (ncp + nyp) * 4
                  + (4 << 20))
    vmem_limit = int(min(max(vmem_limit, 8 << 20), 64 << 20))

    grid = (b_pad // tm,)
    c_pad, y_pad = pl.pallas_call(
        full_model_kernel,
        out_shape=(
            jax.ShapeDtypeStruct((b_pad, ncp), out_dtype),
            jax.ShapeDtypeStruct((b_pad, nyp), out_dtype),
        ),
        grid=grid,
        in_specs=[
            pl.BlockSpec((tm, dp), lambda i: (i, 0)),     # x: tiled over batch
            pl.BlockSpec((dp, ncp), lambda i: (0, 0)),    # w1: VMEM-resident
            pl.BlockSpec((1, ncp), lambda i: (0, 0)),     # b1
            pl.BlockSpec((ncp, nyp), lambda i: (0, 0)),   # w2: VMEM-resident
            pl.BlockSpec((1, nyp), lambda i: (0, 0)),     # b2
        ],
        out_specs=(
            pl.BlockSpec((tm, ncp), lambda i: (i, 0)),
            pl.BlockSpec((tm, nyp), lambda i: (i, 0)),
        ),
        compiler_params=pltpu.CompilerParams(
            dimension_semantics=("parallel",),            # lets v7x shard batch over 2 TCs
            vmem_limit_bytes=vmem_limit,
        ),
    )(x_p, w1_t, b1_p, w2_t, b2_p)

    # Slice away batch/lane padding.
    return c_pad[:B, :n_c], y_pad[:B, :n_y]


def full_model(x, w1, b1, w2, b2):
    """Convenience wrapper matching the PyTorch FullModel.forward signature.

    For serving, call prepare_params() once and reuse its outputs with
    full_model_forward(); this wrapper re-prepares params every call.
    """
    w1_t, b1_p, w2_t, b2_p, d, n_c, n_y = prepare_params(w1, b1, w2, b2)
    return full_model_forward(x, w1_t, b1_p, w2_t, b2_p, d=d, n_c=n_c, n_y=n_y)


if __name__ == "__main__":
    # Small shapes consistent with the forward pass (CIFAR-like NCHW input).
    B, C, H, W = 2, 4, 16, 16
    D = C * H * W          # flattened feature dim for x_to_c_model
    N_CONCEPTS = 32
    N_LABELS = 100         # CIFAR-100 label head

    key = jax.random.PRNGKey(0)
    k_x, k_w1, k_b1, k_w2, k_b2 = jax.random.split(key, 5)

    x = jax.random.normal(k_x, (B, C, H, W), dtype=jnp.float32)
    # PyTorch Linear shapes: weight [out, in], bias [out].
    w1 = jax.random.normal(k_w1, (N_CONCEPTS, D), dtype=jnp.float32) * 0.05
    b1 = jax.random.normal(k_b1, (N_CONCEPTS,), dtype=jnp.float32) * 0.05
    w2 = jax.random.normal(k_w2, (N_LABELS, N_CONCEPTS), dtype=jnp.float32) * 0.05
    b2 = jax.random.normal(k_b2, (N_LABELS,), dtype=jnp.float32) * 0.05

    # Prepare params once (hot path would reuse these).
    w1_t, b1_p, w2_t, b2_p, d_, nc_, ny_ = prepare_params(w1, b1, w2, b2)
    c_out, y_out = full_model_forward(x, w1_t, b1_p, w2_t, b2_p, d=d_, n_c=nc_, n_y=ny_)
    jax.block_until_ready((c_out, y_out))

    assert c_out.shape == (B, N_CONCEPTS) and y_out.shape == (B, N_LABELS)

    # Reference 1: full-f32 forward (loose tolerance covers bf16 MXU feed).
    x_flat = x.reshape(B, -1)
    c_ref32 = jax.nn.sigmoid(x_flat @ w1.T + b1)
    y_ref32 = jax.nn.sigmoid(c_ref32 @ w2.T + b2)
    assert jnp.allclose(c_out, c_ref32, atol=2e-2), float(jnp.abs(c_out - c_ref32).max())
    assert jnp.allclose(y_out, y_ref32, atol=2e-2), float(jnp.abs(y_out - y_ref32).max())

    # Reference 2: bf16-matched numerics (same cast as the kernel), tight tolerance.
    xb = x_flat.astype(jnp.bfloat16)
    w1b = w1.astype(jnp.bfloat16)
    w2b = w2.astype(jnp.bfloat16)
    c_refb = jax.nn.sigmoid(
        jnp.dot(xb, w1b.T, preferred_element_type=jnp.float32) + b1)
    y_refb = jax.nn.sigmoid(
        jnp.dot(c_refb.astype(jnp.bfloat16), w2b.T, preferred_element_type=jnp.float32) + b2)
    assert jnp.allclose(c_out, c_refb, atol=2e-3), float(jnp.abs(c_out - c_refb).max())
    assert jnp.allclose(y_out, y_refb, atol=2e-3), float(jnp.abs(y_out - y_refb).max())

    print("KERNEL_OK")
</pallas_src>

<mosaic_0001>
module attributes {stable_mosaic.version = 11 : i64} {
  func.func @full_model_kernel(%arg0: i32, %arg1: memref<8x1024xbf16, #tpu.memory_space<vmem>>, %arg2: memref<1024x128xbf16, #tpu.memory_space<vmem>>, %arg3: memref<1x128xf32, #tpu.memory_space<vmem>>, %arg4: memref<128x128xbf16, #tpu.memory_space<vmem>>, %arg5: memref<1x128xf32, #tpu.memory_space<vmem>>, %arg6: memref<8x128xf32, #tpu.memory_space<vmem>>, %arg7: memref<8x128xf32, #tpu.memory_space<vmem>>) attributes {dimension_semantics = [#tpu.dimension_semantics<parallel>], iteration_bounds = array<i64: 1>, scalar_prefetch = 0 : i64, scratch_operands = 0 : i64, tpu.core_type = #tpu.core_type<tc>, window_params = [{transform_indices = @transform_0, window_bounds = array<i64: 8, 1024>}, {pipeline_mode = #tpu.pipeline_mode<synchronous>, transform_indices = @transform_1, window_bounds = array<i64: 1024, 128>}, {pipeline_mode = #tpu.pipeline_mode<synchronous>, transform_indices = @transform_2, window_bounds = array<i64: 1, 128>}, {pipeline_mode = #tpu.pipeline_mode<synchronous>, transform_indices = @transform_3, window_bounds = array<i64: 128, 128>}, {pipeline_mode = #tpu.pipeline_mode<synchronous>, transform_indices = @transform_4, window_bounds = array<i64: 1, 128>}, {transform_indices = @transform_5, window_bounds = array<i64: 8, 128>}, {transform_indices = @transform_6, window_bounds = array<i64: 8, 128>}]} {
    %c0 = arith.constant 0 : index
    %c0_0 = arith.constant 0 : index
    %0 = vector.load %arg1[%c0, %c0_0] : memref<8x1024xbf16, #tpu.memory_space<vmem>>, vector<8x1024xbf16>
    %c0_1 = arith.constant 0 : index
    %c0_2 = arith.constant 0 : index
    %1 = vector.load %arg2[%c0_1, %c0_2] : memref<1024x128xbf16, #tpu.memory_space<vmem>>, vector<1024x128xbf16>
    %cst = arith.constant dense<0.000000e+00> : vector<8x128xf32>
    %2 = tpu.matmul %0, %1, %cst {dimension_numbers = #tpu.dot_dimension_numbers<[1], [0], [0], [1], [0, 0, 1, 1], [], []>} : vector<8x1024xbf16>, vector<1024x128xbf16>, vector<8x128xf32> -> vector<8x128xf32>
    %c0_3 = arith.constant 0 : index
    %c0_4 = arith.constant 0 : index
    %3 = vector.load %arg3[%c0_3, %c0_4] : memref<1x128xf32, #tpu.memory_space<vmem>>, vector<1x128xf32>
    %4 = vector.broadcast %3 : vector<1x128xf32> to vector<8x128xf32>
    %5 = arith.addf %2, %4 : vector<8x128xf32>
    %6 = arith.negf %5 : vector<8x128xf32>
    %7 = math.exp %6 : vector<8x128xf32>
    %cst_5 = arith.constant 1.000000e+00 : f32
    %8 = vector.broadcast %cst_5 : f32 to vector<8x128xf32>
    %9 = arith.addf %8, %7 : vector<8x128xf32>
    %10 = arith.divf %8, %9 : vector<8x128xf32>
    %c0_6 = arith.constant 0 : index
    %c0_7 = arith.constant 0 : index
    %11 = vector.load %arg6[%c0_6, %c0_7] : memref<8x128xf32, #tpu.memory_space<vmem>>, vector<8x128xf32>
    tpu.vector_store %arg6[%c0_6, %c0_7], %10 {strides = array<i32>} : memref<8x128xf32, #tpu.memory_space<vmem>>, vector<8x128xf32>,
    %12 = arith.truncf %10 : vector<8x128xf32> to vector<8x128xbf16>
    %c0_8 = arith.constant 0 : index
    %c0_9 = arith.constant 0 : index
    %13 = vector.load %arg4[%c0_8, %c0_9] : memref<128x128xbf16, #tpu.memory_space<vmem>>, vector<128x128xbf16>
    %cst_10 = arith.constant dense<0.000000e+00> : vector<8x128xf32>
    %14 = tpu.matmul %12, %13, %cst_10 {dimension_numbers = #tpu.dot_dimension_numbers<[1], [0], [0], [1], [0, 0, 1, 1], [], []>} : vector<8x128xbf16>, vector<128x128xbf16>, vector<8x128xf32> -> vector<8x128xf32>
    %c0_11 = arith.constant 0 : index
    %c0_12 = arith.constant 0 : index
    %15 = vector.load %arg5[%c0_11, %c0_12] : memref<1x128xf32, #tpu.memory_space<vmem>>, vector<1x128xf32>
    %16 = vector.broadcast %15 : vector<1x128xf32> to vector<8x128xf32>
    %17 = arith.addf %14, %16 : vector<8x128xf32>
    %18 = arith.negf %17 : vector<8x128xf32>
    %19 = math.exp %18 : vector<8x128xf32>
    %cst_13 = arith.constant 1.000000e+00 : f32
    %20 = vector.broadcast %cst_13 : f32 to vector<8x128xf32>
    %21 = arith.addf %20, %19 : vector<8x128xf32>
    %22 = arith.divf %20, %21 : vector<8x128xf32>
    %c0_14 = arith.constant 0 : index
    %c0_15 = arith.constant 0 : index
    %23 = vector.load %arg7[%c0_14, %c0_15] : memref<8x128xf32, #tpu.memory_space<vmem>>, vector<8x128xf32>
    tpu.vector_store %arg7[%c0_14, %c0_15], %22 {strides = array<i32>} : memref<8x128xf32, #tpu.memory_space<vmem>>, vector<8x128xf32>,
    return
  }
  func.func @transform_0(%arg0: i32) -> (i32, i32) {
    %c0_i32 = arith.constant 0 : i32
    %c0_i32_0 = arith.constant 0 : i32
    return %arg0, %c0_i32 : i32, i32
  }
  func.func @transform_1(%arg0: i32) -> (i32, i32) {
    %c0_i32 = arith.constant 0 : i32
    %c0_i32_0 = arith.constant 0 : i32
    %c0_i32_1 = arith.constant 0 : i32
    return %c0_i32, %c0_i32_0 : i32, i32
  }
  func.func @transform_2(%arg0: i32) -> (i32, i32) {
    %c0_i32 = arith.constant 0 : i32
    %c0_i32_0 = arith.constant 0 : i32
    %c0_i32_1 = arith.constant 0 : i32
    return %c0_i32, %c0_i32_0 : i32, i32
  }
  func.func @transform_3(%arg0: i32) -> (i32, i32) {
    %c0_i32 = arith.constant 0 : i32
    %c0_i32_0 = arith.constant 0 : i32
    %c0_i32_1 = arith.constant 0 : i32
    return %c0_i32, %c0_i32_0 : i32, i32
  }
  func.func @transform_4(%arg0: i32) -> (i32, i32) {
    %c0_i32 = arith.constant 0 : i32
    %c0_i32_0 = arith.constant 0 : i32
    %c0_i32_1 = arith.constant 0 : i32
    return %c0_i32, %c0_i32_0 : i32, i32
  }
  func.func @transform_5(%arg0: i32) -> (i32, i32) {
    %c0_i32 = arith.constant 0 : i32
    %c0_i32_0 = arith.constant 0 : i32
    return %arg0, %c0_i32 : i32, i32
  }
  func.func @transform_6(%arg0: i32) -> (i32, i32) {
    %c0_i32 = arith.constant 0 : i32
    %c0_i32_0 = arith.constant 0 : i32
    return %arg0, %c0_i32 : i32, i32
  }
}

</mosaic_0001>

<bundles_post_ra>
// kernel: full_model_forward.1
= control target key start
LH: loop header
LB: loop body
LE: loop exit
PB: predicated region body
PF: predicated region fallthrough
CT: control target
= control target key end

     0   :  { %12 = vsyncpa [#allocation3], 0  ;;  %s1201_s21 = smov [#allocation2]   ;;  %s1301_s0 = inlined_call_operand.vmem [shape: bf16[8,1024], index: 0, kind: input, shape index: {}]   ;;  %s1302_s1 = inlined_call_operand.hbm [shape: bf16[1024,128], index: 1, kind: input, shape index: {}]   ;;  %s1303_s2 = inlined_call_operand.vmem [shape: f32[1,128], index: 2, kind: input, shape index: {}]   ;;  %s1304_s3 = inlined_call_operand.vmem [shape: bf16[128,128], index: 3, kind: input, shape index: {}]   ;;  %s1305_s4 = inlined_call_operand.vmem [shape: f32[1,128], index: 4, kind: input, shape index: {}]   ;;  %s1306_s5 = inlined_call_operand.vmem [shape: f32[8,128], index: 5, kind: output, shape index: {0}]   ;;  %s1307_s6 = inlined_call_operand.vmem [shape: f32[8,128], index: 6, kind: output, shape index: {1}]  }
   0x1   :  { %s20_s22 = sshll.u32 %s1201_s21, 4  ;;  %s1177_s25 = scalar_lea.hbm %s1302_s1, 8192  ;;  %s21_s22 = int_to_ptr.vmem [resolvable:$true] %s20_s22 }
   0x2   :  { %p1178_p0 = scmp.ne.s32.totalorder %s1302_s1, %s1177_s25  ;;  %p1181_p1 = scmp.lt.u32.totalorder %s1177_s25, %s1302_s1 }
   0x4   :  { %p1183_p2 = pnand %p1181_p1, %p1178_p0 }
   0x6   :  { %1186 = shalt.err (!%p1183_p2)
}
   0x7   :  { %s1187_s30 = scalar_lea.vmem %s21_s22, 8192  ;;  %p1192_p4 = scmp.lt.s32.totalorder %s21_s22, %s21_s22 }
   0x8   :  { %p1188_p3 = scmp.ne.s32.totalorder %s21_s22, %s1187_s30  ;;  %p1193_p5 = scmp.lt.s32.totalorder %s1187_s30, %s1187_s30 }
   0xa   :  { %p1194_p6 = por %p1193_p5, %p1192_p4 }
   0xc   :  { %p1195_p7 = pnand %p1194_p6, %p1188_p3 }
   0xe   :  { %1198 = shalt.err (!%p1195_p7)
}
   0xf   :  { %s1202_s7 = smov 64   ;;  %s1203_s8 = smov 4  }
  0x10   :  { %26 = dma.hbm_to_vmem [thread:$0]  %s1302_s1, 8192, %s21_s22, [#allocation3], %s1202_s7, %s1202_s7, %s1203_s8  }
  0x11   :  { %1199 = dma.done.wait [#allocation3], 8192  }
  0x12   :  { %1200 = vsyncadd [#allocation3], 4294959104  ;;  %v1089_v0 = vld [vmem:[#allocation2 + $0x40] sm:$0xff]   ;;  %v1093_v4 = vld [vmem:[#allocation2 + $0x48] sm:$0xff]   ;;  %vm1205_vm0 = vmmov 0  }
  0x13   :  { %v1090_v1 = vld [vmem:[#allocation2 + $0xc0] sm:$0xff]   ;;  %967 = vmatprep.subr.bf16.mxu0 %v1089_v0  ;;  %v1094_v5 = vld [vmem:[#allocation2 + $0xc8] sm:$0xff]   ;;  %v1097_v8 = vld [vmem:[#allocation2 + $0x50] sm:$0xff]  }
  0x14   :  { %v1091_v2 = vld [vmem:[#allocation2] sm:$0xff]   ;;  %989 = vmatprep.subr.bf16.mxu1 %v1090_v1  ;;  %v1095_v6 = vld [vmem:[#allocation2 + $0x8] sm:$0xff]   ;;  %v1098_v9 = vld [vmem:[#allocation2 + $0xd0] sm:$0xff]  }
  0x15   :  { %v1092_v3 = vld [vmem:[#allocation2 + $0x80] sm:$0xff]   ;;  %968 = vmatpush3.bf16.msra.mxu0 %v1091_v2  ;;  %v1096_v7 = vld [vmem:[#allocation2 + $0x88] sm:$0xff]   ;;  %v1099_v10 = vld [vmem:[#allocation2 + $0x10] sm:$0xff]  }
  0x16   :  { %990 = vmatpush3.bf16.msra.mxu1 %v1092_v3  ;;  %969 = vmatprep.subr.bf16.mxu0 %v1093_v4  ;;  %v1100_v11 = vld [vmem:[#allocation2 + $0x90] sm:$0xff]   ;;  %v1101_v12 = vld [vmem:[#allocation2 + $0x58] sm:$0xff]   ;;  %v1105_v16 = vld [vmem:[#allocation2 + $0x60] sm:$0xff]  }
  0x17   :  { %991 = vmatprep.subr.bf16.mxu1 %v1094_v5  ;;  %v1102_v13 = vld [vmem:[#allocation2 + $0xd8] sm:$0xff]   ;;  %v1106_v17 = vld [vmem:[#allocation2 + $0xe0] sm:$0xff]   ;;  %v1109_v20 = vld [vmem:[#allocation2 + $0x68] sm:$0xff]  }
  0x18   :  { %v1103_v14 = vld [vmem:[#allocation2 + $0x18] sm:$0xff]   ;;  %v1107_v18 = vld [vmem:[#allocation2 + $0x20] sm:$0xff]   ;;  %v1110_v21 = vld [vmem:[#allocation2 + $0xe8] sm:$0xff]  }
  0x19   :  { %970 = vmatpush3.bf16.msra.mxu0 %v1095_v6  ;;  %v1104_v15 = vld [vmem:[#allocation2 + $0x98] sm:$0xff]   ;;  %v1108_v19 = vld [vmem:[#allocation2 + $0xa0] sm:$0xff]   ;;  %v1111_v22 = vld [vmem:[#allocation2 + $0x28] sm:$0xff]  }
  0x1a   :  { %992 = vmatpush3.bf16.msra.mxu1 %v1096_v7  ;;  %971 = vmatprep.subr.bf16.mxu0 %v1097_v8  ;;  %v1112_v23 = vld [vmem:[#allocation2 + $0xa8] sm:$0xff]   ;;  %v1113_v24 = vld [vmem:[#allocation2 + $0x70] sm:$0xff]   ;;  %v1117_v28 = vld [vmem:[#allocation2 + $0x78] sm:$0xff]  }
  0x1b   :  { %993 = vmatprep.subr.bf16.mxu1 %v1098_v9  ;;  %v1114_v25 = vld [vmem:[#allocation2 + $0xf0] sm:$0xff]   ;;  %v1118_v29 = vld [vmem:[#allocation2 + $0xf8] sm:$0xff]   ;;  %v37_v32 = vld [vmem:[%s1301_s0] sm:$0xff] }
  0x1c   :  { %v1115_v26 = vld [vmem:[#allocation2 + $0x30] sm:$0xff]   ;;  %v1119_v30 = vld [vmem:[#allocation2 + $0x38] sm:$0xff]   ;;  %v38_v33 = vld [vmem:[%s1301_s0 + $0x8] sm:$0xff]  ;;  %v884_v34 = vcombine.low %v37_v32, %v37_v32  ;;  %v885_v35 = vcombine.high %v37_v32, %v37_v32 }
  0x1d   :  { %972 = vmatpush3.bf16.msra.mxu0 %v1099_v10  ;;  %v1116_v27 = vld [vmem:[#allocation2 + $0xb0] sm:$0xff]   ;;  %v1120_v31 = vld [vmem:[#allocation2 + $0xb8] sm:$0xff]   ;;  %v886_v36 = vcombine.low %v38_v33, %v38_v33  ;;  %v887_v37 = vcombine.high %v38_v33, %v38_v33  ;;  %v1125_v38 = vld [vmem:[#allocation2 + $0x140] sm:$0xff]  }
  0x1e   :  { %994 = vmatpush3.bf16.msra.mxu1 %v1100_v11  ;;  %973 = vmatprep.subr.bf16.mxu0 %v1101_v12  ;;  %v1126_v39 = vld [vmem:[#allocation2 + $0x1c0] sm:$0xff]   ;;  %v1129_v42 = vld [vmem:[#allocation2 + $0x148] sm:$0xff]   ;;  %v1133_v46 = vld [vmem:[#allocation2 + $0x150] sm:$0xff]  }
  0x1f   :  { %995 = vmatprep.subr.bf16.mxu1 %v1102_v13  ;;  %620 = vmatprep.mubr.bf16.mxu0 %v885_v35  ;;  %v1127_v40 = vld [vmem:[#allocation2 + $0x100] sm:$0xff]   ;;  %v1130_v43 = vld [vmem:[#allocation2 + $0x1c8] sm:$0xff]   ;;  %v1134_v47 = vld [vmem:[#allocation2 + $0x1d0] sm:$0xff]   ;;  %v1204_v13 = vmov 0.0  }
  0x20   :  { %660 = vmatprep.mubr.bf16.mxu1 %v887_v37  ;;  %v1128_v41 = vld [vmem:[#allocation2 + $0x180] sm:$0xff]   ;;  %v1131_v44 = vld [vmem:[#allocation2 + $0x108] sm:$0xff]   ;;  %v1135_v48 = vld [vmem:[#allocation2 + $0x110] sm:$0xff]  }
  0x21   :  { %974 = vmatpush3.bf16.msra.mxu0 %v1103_v14  ;;  %v1132_v45 = vld [vmem:[#allocation2 + $0x188] sm:$0xff]   ;;  %v1136_v49 = vld [vmem:[#allocation2 + $0x190] sm:$0xff]   ;;  %v1137_v50 = vld [vmem:[#allocation2 + $0x158] sm:$0xff]  }
  0x22   :  { %996 = vmatpush3.bf16.msra.mxu1 %v1104_v15  ;;  %975 = vmatprep.subr.bf16.mxu0 %v1105_v16  ;;  %v1138_v51 = vld [vmem:[#allocation2 + $0x1d8] sm:$0xff]   ;;  %v1141_v54 = vld [vmem:[#allocation2 + $0x160] sm:$0xff]   ;;  %v1145_v58 = vld [vmem:[#allocation2 + $0x168] sm:$0xff]  }
  0x23   :  { %997 = vmatprep.subr.bf16.mxu1 %v1106_v17  ;;  %v1139_v52 = vld [vmem:[#allocation2 + $0x118] sm:$0xff]   ;;  %v1142_v55 = vld [vmem:[#allocation2 + $0x1e0] sm:$0xff]   ;;  %v1146_v59 = vld [vmem:[#allocation2 + $0x1e8] sm:$0xff]  }
  0x24   :  { %v1140_v53 = vld [vmem:[#allocation2 + $0x198] sm:$0xff]   ;;  %v1143_v56 = vld [vmem:[#allocation2 + $0x120] sm:$0xff]   ;;  %v1147_v60 = vld [vmem:[#allocation2 + $0x128] sm:$0xff]  }
  0x25   :  { %976 = vmatpush3.bf16.msra.mxu0 %v1107_v18  ;;  %v1144_v57 = vld [vmem:[#allocation2 + $0x1a0] sm:$0xff]   ;;  %v1148_v61 = vld [vmem:[#allocation2 + $0x1a8] sm:$0xff]   ;;  %v1149_v62 = vld [vmem:[#allocation2 + $0x170] sm:$0xff]  }
  0x26   :  { %998 = vmatpush3.bf16.msra.mxu1 %v1108_v19  ;;  %977 = vmatprep.subr.bf16.mxu0 %v1109_v20  ;;  %v1150_v63 = vld [vmem:[#allocation2 + $0x1f0] sm:$0xff]   ;;  %v1153_v2 = vld [vmem:[#allocation2 + $0x178] sm:$0xff]   ;;  %v1161_v12 = vld [vmem:[%s1304_s3] sm:$0xff]  }
  0x27   :  { %999 = vmatprep.subr.bf16.mxu1 %v1110_v21  ;;  %v1151_v0 = vld [vmem:[#allocation2 + $0x130] sm:$0xff]   ;;  %v1154_v3 = vld [vmem:[#allocation2 + $0x1f8] sm:$0xff]   ;;  %v1162_v14 = vld [vmem:[%s1304_s3 + $0x8] sm:$0xff]  }
  0x28   :  { %v1152_v1 = vld [vmem:[#allocation2 + $0x1b0] sm:$0xff]   ;;  %v1155_v4 = vld [vmem:[#allocation2 + $0x138] sm:$0xff]   ;;  %v1165_v17 = vld [vmem:[%s1304_s3 + $0x20] sm:$0xff]  }
  0x29   :  { %978 = vmatpush3.bf16.msra.mxu0 %v1111_v22  ;;  %v1156_v5 = vld [vmem:[#allocation2 + $0x1b8] sm:$0xff]   ;;  %v39_v6 = vld [vmem:[%s1301_s0 + $0x10] sm:$0xff]  ;;  %v1166_v18 = vld [vmem:[%s1304_s3 + $0x28] sm:$0xff]  }
  0x2a   :  { %1000 = vmatpush3.bf16.msra.mxu1 %v1112_v23  ;;  %979 = vmatprep.subr.bf16.mxu0 %v1113_v24  ;;  %v888_v7 = vcombine.low %v39_v6, %v39_v6  ;;  %v889_v8 = vcombine.high %v39_v6, %v39_v6  ;;  %v40_v9 = vld [vmem:[%s1301_s0 + $0x18] sm:$0xff]  ;;  %v1163_v15 = vld [vmem:[%s1304_s3 + $0x10] sm:$0xff]   ;;  %v883_v23 = vld [vmem:[%s1303_s2] ss:$0 sm:$0xff] }
  0x2b   :  { %1001 = vmatprep.subr.bf16.mxu1 %v1114_v25  ;;  %v890_v10 = vcombine.low %v40_v9, %v40_v9  ;;  %v891_v11 = vcombine.high %v40_v9, %v40_v9  ;;  %v1164_v16 = vld [vmem:[%s1304_s3 + $0x18] sm:$0xff]   ;;  %v1167_v19 = vld [vmem:[%s1304_s3 + $0x30] sm:$0xff]  }
  0x2c   :  { %v1168_v20 = vld [vmem:[%s1304_s3 + $0x38] sm:$0xff]  }
  0x2d   :  { %980 = vmatpush3.bf16.msra.mxu0 %v1115_v26 }
  0x2e   :  { %1002 = vmatpush3.bf16.msra.mxu1 %v1116_v27  ;;  %981 = vmatprep.subr.bf16.mxu0 %v1117_v28 }
  0x2f   :  { %1003 = vmatprep.subr.bf16.mxu1 %v1118_v29 }
  0x31   :  { %982 = vmatpush3.bf16.msra.mxu0 %v1119_v30 }
  0x32   :  { %1004 = vmatpush3.bf16.msra.mxu1 %v1120_v31  ;;  %1011 = vmatprep.subr.bf16.mxu0 %v1125_v38 }
  0x33   :  { %1033 = vmatprep.subr.bf16.mxu1 %v1126_v39 }
  0x34   :  { %621 = vmatmul.mubr.bf16.vlgmr.msra.gmra.mrb[0].mxu0 %v884_v34 }
  0x35   :  { %661 = vmatmul.mubr.bf16.vlgmr.msra.gmra.mrb[0].mxu1 %v886_v36  ;;  %1012 = vmatpush3.bf16.msra.mxu0 %v1127_v40 }
  0x36   :  { %1034 = vmatpush3.bf16.msra.mxu1 %v1128_v41  ;;  %1013 = vmatprep.subr.bf16.mxu0 %v1129_v42 }
  0x37   :  { %1035 = vmatprep.subr.bf16.mxu1 %v1130_v43  ;;  %700 = vmatprep.mubr.bf16.mxu0 %v889_v8 }
  0x38   :  { %740 = vmatprep.mubr.bf16.mxu1 %v891_v11 }
  0x39   :  { %1014 = vmatpush3.bf16.msra.mxu0 %v1131_v44 }
  0x3a   :  { %1036 = vmatpush3.bf16.msra.mxu1 %v1132_v45  ;;  %1015 = vmatprep.subr.bf16.mxu0 %v1133_v46 }
  0x3b   :  { %1037 = vmatprep.subr.bf16.mxu1 %v1134_v47 }
  0x3d   :  { %1016 = vmatpush3.bf16.msra.mxu0 %v1135_v48 }
  0x3e   :  { %1038 = vmatpush3.bf16.msra.mxu1 %v1136_v49  ;;  %1017 = vmatprep.subr.bf16.mxu0 %v1137_v50 }
  0x3f   :  { %1039 = vmatprep.subr.bf16.mxu1 %v1138_v51  ;;  %v957_v51 = vld [vmem:[%s1305_s4] ss:$0 sm:$0xff] }
  0x41   :  { %1018 = vmatpush3.bf16.msra.mxu0 %v1139_v52 }
  0x42   :  { %1040 = vmatpush3.bf16.msra.mxu1 %v1140_v53  ;;  %1019 = vmatprep.subr.bf16.mxu0 %v1141_v54 }
  0x43   :  { %1041 = vmatprep.subr.bf16.mxu1 %v1142_v55 }
  0x45   :  { %1020 = vmatpush3.bf16.msra.mxu0 %v1143_v56 }
  0x46   :  { %1042 = vmatpush3.bf16.msra.mxu1 %v1144_v57  ;;  %1021 = vmatprep.subr.bf16.mxu0 %v1145_v58 }
  0x47   :  { %1043 = vmatprep.subr.bf16.mxu1 %v1146_v59 }
  0x49   :  { %1022 = vmatpush3.bf16.msra.mxu0 %v1147_v60 }
  0x4a   :  { %1044 = vmatpush3.bf16.msra.mxu1 %v1148_v61  ;;  %1023 = vmatprep.subr.bf16.mxu0 %v1149_v62 }
  0x4b   :  { %1045 = vmatprep.subr.bf16.mxu1 %v1150_v63 }
  0x4d   :  { %1024 = vmatpush3.bf16.msra.mxu0 %v1151_v0 }
  0x4e   :  { %1046 = vmatpush3.bf16.msra.mxu1 %v1152_v1  ;;  %1025 = vmatprep.subr.bf16.mxu0 %v1153_v2 }
  0x4f   :  { %1047 = vmatprep.subr.bf16.mxu1 %v1154_v3 }
  0x51   :  { %1026 = vmatpush3.bf16.msra.mxu0 %v1155_v4 }
  0x52   :  { %1048 = vmatpush3.bf16.msra.mxu1 %v1156_v5  ;;  %1064 = vmatprep.subr.bf16.mxu0 %v1204_v13 }
  0x54   :  { %701 = vmatmul.mubr.bf16.vlgmr.msra.gmra.mrb[4].mxu0 %v888_v7 }
  0x55   :  { %741 = vmatmul.mubr.bf16.vlgmr.msra.gmra.mrb[4].mxu1 %v890_v10  ;;  %1065 = vmatpush3.bf16.msra.mxu0 %v1161_v12 }
  0x56   :  { %1066 = vmatprep.subr.bf16.mxu0 %v1204_v13  ;;  %1080 = vmatprep.mubr.msk.bf16.mxu0 %vm1205_vm0, %v1204_v13 }
  0x59   :  { %1067 = vmatpush3.bf16.msra.mxu0 %v1162_v14 }
  0x5a   :  { %1068 = vmatprep.subr.bf16.mxu0 %v1204_v13 }
  0x5d   :  { %1069 = vmatpush3.bf16.msra.mxu0 %v1163_v15 }
  0x5e   :  { %1070 = vmatprep.subr.bf16.mxu0 %v1204_v13 }
  0x61   :  { %1071 = vmatpush3.bf16.msra.mxu0 %v1164_v16 }
  0x62   :  { %1072 = vmatprep.subr.bf16.mxu0 %v1204_v13 }
  0x65   :  { %1073 = vmatpush3.bf16.msra.mxu0 %v1165_v17 }
  0x66   :  { %1074 = vmatprep.subr.bf16.mxu0 %v1204_v13 }
  0x69   :  { %1075 = vmatpush3.bf16.msra.mxu0 %v1166_v18 }
  0x6a   :  { %1076 = vmatprep.subr.bf16.mxu0 %v1204_v13 }
  0x6d   :  { %1077 = vmatpush3.bf16.msra.mxu0 %v1167_v19 }
  0x6e   :  { %1078 = vmatprep.subr.bf16.mxu0 %v1204_v13 }
  0x71   :  { %1079 = vmatpush3.bf16.msra.mxu0 %v1168_v20 }
 0x107   :  { %v983_v21 = vpop.f32.mrb[0].mxu0 }
 0x108   :  { %v1005_v22 = vpop.f32.mrb[0].mxu1  ;;  %v984_v24 = vpop.f32.mrb[1].mxu0 }
 0x109   :  { %v1006_v25 = vpop.f32.mrb[1].mxu1  ;;  %v985_v26 = vadd.f32 %v984_v24, %v983_v21  ;;  %v986_v28 = vpop.f32.mrb[2].mxu0 }
 0x10a   :  { %v1007_v27 = vadd.f32 %v1006_v25, %v1005_v22  ;;  %v1008_v29 = vpop.f32.mrb[2].mxu1  ;;  %v987_v30 = vpop.f32.mrb[3].mxu0 }
 0x10b   :  { %v1009_v31 = vpop.f32.mrb[3].mxu1  ;;  %v623_v32 = vadd.f32 %v985_v26, %v883_v23 }
 0x10d   :  { %v663_v33 = vadd.f32 %v1007_v27, %v623_v32 }
 0x127   :  { %v1027_v34 = vpop.f32.mrb[4].mxu0 }
 0x128   :  { %v1049_v35 = vpop.f32.mrb[4].mxu1  ;;  %v1028_v36 = vpop.f32.mrb[5].mxu0 }
 0x129   :  { %v1050_v37 = vpop.f32.mrb[5].mxu1  ;;  %v1029_v38 = vadd.f32 %v1028_v36, %v1027_v34  ;;  %v1030_v40 = vpop.f32.mrb[6].mxu0 }
 0x12a   :  { %v1051_v39 = vadd.f32 %v1050_v37, %v1049_v35  ;;  %v1052_v41 = vpop.f32.mrb[6].mxu1  ;;  %v1031_v42 = vpop.f32.mrb[7].mxu0 }
 0x12b   :  { %v1053_v43 = vpop.f32.mrb[7].mxu1  ;;  %v703_v44 = vadd.f32 %v1029_v38, %v663_v33 }
 0x12d   :  { %v743_v45 = vadd.f32 %v1051_v39, %v703_v44 }
 0x12f   :  { %v956_v46 = vmul.f32 -1.442695, %v743_v45 }
 0x131   :  { %1169 = vpow2.f32 %v956_v46 }
 0x13b   :  { %v1170_v47 = vpop.eup %1169 }
 0x13c   :  { %v751_v48 = vadd.f32 1.0, %v1170_v47 }
 0x13e   :  { %1171 = vrcp.f32 %v751_v48 }
 0x148   :  { %v1172_v49 = vpop.eup %1171 }
 0x149   :  { %754 = vst [vmem:[%s1306_s5] sm:$0xff] %v1172_v49  ;;  %v755_v50 = vpack.c.bf16 %v1172_v49, %v1172_v49 }
 0x14b   :  { %1081 = vmatmul.mubr.bf16.vlgmr.msra.gmra.mrb[8].mxu0 %v755_v50 }
 0x21e   :  { %v861_v52 = vpop.f32.mrb[8].mxu0 }
 0x21f   :  { %v862_v53 = vadd.f32 %v957_v51, %v861_v52  ;;  %v1082_v54 = vpop.f32.mrb[9].mxu0 }
 0x220   :  { %v864_v55 = vpop.f32.mrb[10].mxu0 }
 0x221   :  { %v966_v56 = vmul.f32 -1.442695, %v862_v53  ;;  %v1083_v57 = vpop.f32.mrb[11].mxu0 }
 0x223   :  { %1173 = vpow2.f32 %v966_v56 }
 0x22d   :  { %v1174_v58 = vpop.eup %1173 }
 0x22e   :  { %v870_v59 = vadd.f32 1.0, %v1174_v58 }
 0x230   :  { %1175 = vrcp.f32 %v870_v59 }
 0x23a   :  { %v1176_v60 = vpop.eup %1175 }
 0x23b   :  { %873 = vst [vmem:[%s1307_s6] sm:$0xff] %v1176_v60 }
 0x23c   :  { %882 = vsyncpa [#allocation3], 1 }

</bundles_post_ra>
